<compile_context>
chip_gen: v7x
topology: tpu7x:2x2x1
jax: 0.10.0
libtpu: 0.0.40
codegen_flags: <defaults>
</compile_context>

<pallas_src>
import functools

import jax
import jax.numpy as jnp
from jax import lax
from jax.experimental import pallas as pl
from jax.experimental.pallas import tpu as pltpu

EPS = 1e-5                 # PyTorch LayerNorm default
_LANE = 128
_MIN_GRID_STEPS = 8        # >=2-4 steps per TensorCore on v7x (2 TCs)


def _round_up(a, b):
    return -(-a // b) * b


# ---------------------------------------------------------------------------
# One-time probe: can this JAX build single-buffer a grid-invariant operand?
# (pl.Buffered(1) reclaims the weight's second pipeline buffer -- matters on
#  v7x's 64 MiB VMEM for large Swin widths.)  Runs OUTSIDE any jit.
# ---------------------------------------------------------------------------
def _probe_single_buffer():
    try:
        def _copy(x_ref, o_ref):
            o_ref[...] = x_ref[...]
        out = pl.pallas_call(
            _copy,
            out_shape=jax.ShapeDtypeStruct((8, 128), jnp.float32),
            grid=(2,),
            in_specs=[pl.BlockSpec((8, 128), lambda i: (0, 0),
                                   pipeline_mode=pl.Buffered(1))],
            out_specs=pl.BlockSpec((8, 128), lambda i: (0, 0)),
        )(jnp.zeros((8, 128), jnp.float32))
        jax.block_until_ready(out)
        return True
    except Exception:
        return False


_SINGLE_BUFFER_INVARIANTS = _probe_single_buffer()


def _vmem_limits():
    """Generation-aware VMEM budget/limit (v5e/v6e: 128 MiB, v7x: 64 MiB)."""
    try:
        cap = int(pltpu.get_tpu_info().vmem_capacity_bytes)
    except Exception:
        cap = 64 * 1024 * 1024          # conservative (v7x) fallback
    cap = max(32 * 1024 * 1024, min(cap, 128 * 1024 * 1024))
    budget = int(cap * 0.55)            # tiles + in-kernel temporaries target
    limit = int(cap * 0.85)             # scoped-VMEM request
    return budget, limit


def _pick_tile(nb, batch, tm_req, cin, cout, tok_itemsize, w_itemsize,
               vmem_budget, single_buf):
    """Token tile: multiple of 128 lanes, >=_MIN_GRID_STEPS grid steps when the
    token count allows it, and sized against a VMEM model that includes the
    in-kernel f32/bf16 temporaries (review item for v7x)."""
    if nb <= _LANE:
        return nb                               # one full-width block per image
    max_tm = (nb // _LANE) * _LANE              # keep block <= token count
    tm = min(_round_up(tm_req, _LANE), max_tm)
    min_tiles = -(-_MIN_GRID_STEPS // max(batch, 1))
    tm = min(tm, max(_LANE, _round_up(-(-nb // min_tiles), _LANE)))
    tm = min(tm, max_tm)

    wbuf = 1 if single_buf else 2

    def vmem_bytes(t):
        return (2 * cin * t * tok_itemsize          # double-buffered input tile
                + 2 * cout * t * 4                  # double-buffered f32 output
                + wbuf * cout * cin * w_itemsize    # reduction weight
                + 2 * wbuf * (cin + cout) * 4       # LayerNorm params
                + t * (10 * cin + 8 * cout))        # x/xn f32, xn bf16, y/yn f32

    while tm > _LANE and vmem_bytes(tm) > vmem_budget:
        tm -= _LANE
    return max(tm, _LANE)


def _enlarge_kernel(x_ref, w_ref, g1_ref, b1_ref, g2_ref, b2_ref, o_ref):
    """Feature-major per-tile: LayerNorm(4C) -> W @ x (MXU) -> LayerNorm(2C).

    x_ref : (4C, tm)  token tile (lane axis = tokens)
    w_ref : (2C, 4C)  nn.Linear weight in PyTorch (out, in) layout
    g*/b* : (4C, 1) / (2C, 1) LayerNorm affine params (f32)
    o_ref : (2C, tm)
    """
    x = x_ref[...].astype(jnp.float32)                     # f32 LN math (v5e-safe)

    # LayerNorm over merged channels (sublane axis); two-pass variance.
    mu = jnp.mean(x, axis=0, keepdims=True)                # (1, tm)
    xc = x - mu
    var = jnp.mean(xc * xc, axis=0, keepdims=True)
    xn = xc * lax.rsqrt(var + EPS) * g1_ref[...] + b1_ref[...]

    # reduction Linear (no bias) on the MXU; f32 accumulation.  (MXU shape is
    # deliberately not tuned -- the kernel is HBM-bound at these intensities.)
    y = jnp.dot(w_ref[...], xn.astype(w_ref.dtype),
                preferred_element_type=jnp.float32)        # (2C, tm)

    # norm_enlarge LayerNorm over out_chans; two-pass variance.
    mu2 = jnp.mean(y, axis=0, keepdims=True)
    yc = y - mu2
    var2 = jnp.mean(yc * yc, axis=0, keepdims=True)
    yn = yc * lax.rsqrt(var2 + EPS) * g2_ref[...] + b2_ref[...]
    o_ref[...] = yn.astype(o_ref.dtype)


def _enlarge_channel_tokens(tokens, w, g1, b1, g2, b2, *, tm=512):
    """tokens: (B, 4C, Nb) per-batch feature-major. Returns (B, 2C, Nb) f32."""
    batch, cin, nb = tokens.shape
    cout = w.shape[0]
    single_buf = _SINGLE_BUFFER_INVARIANTS
    budget, limit = _vmem_limits()
    tm_eff = _pick_tile(nb, batch, tm, cin, cout,
                        tokens.dtype.itemsize, w.dtype.itemsize,
                        budget, single_buf)
    grid = (batch, pl.cdiv(nb, tm_eff))        # ragged last tile: no jnp.pad

    def const_spec(shape):
        # Grid-invariant operand: single-buffer it when supported.
        if single_buf:
            return pl.BlockSpec(shape, lambda b, t: (0, 0),
                                pipeline_mode=pl.Buffered(1))
        return pl.BlockSpec(shape, lambda b, t: (0, 0))

    return pl.pallas_call(
        _enlarge_kernel,
        out_shape=jax.ShapeDtypeStruct((batch, cout, nb), jnp.float32),
        grid_spec=pltpu.PrefetchScalarGridSpec(
            num_scalar_prefetch=0,
            grid=grid,
            in_specs=[
                # Token tile (batch dim squeezed); lane axis = tokens.  The
                # last tile may be ragged; Pallas masks out-of-range columns.
                # TODO(synk): bump to pipeline_mode=pl.Buffered(3) only if
                # traces still show exposed input DMA after the VMEM fixes.
                pl.BlockSpec((None, cin, tm_eff), lambda b, t: (b, 0, t)),
                const_spec((cout, cin)),   # reduction weight (grid-invariant)
                const_spec((cin, 1)),      # LN1 gamma
                const_spec((cin, 1)),      # LN1 beta
                const_spec((cout, 1)),     # LN2 gamma
                const_spec((cout, 1)),     # LN2 beta
            ],
            out_specs=pl.BlockSpec((None, cout, tm_eff), lambda b, t: (b, 0, t)),
        ),
        compiler_params=pltpu.CompilerParams(
            dimension_semantics=("parallel", "parallel"),
            vmem_limit_bytes=limit),
    )(tokens, w, g1, b1, g2, b2)


def enlarge_channel_forward(x, params, *, scale_rate, tm=512,
                            token_dtype=jnp.bfloat16,
                            matmul_dtype=jnp.bfloat16):
    """x: (B, C, H, W) NCHW like the PyTorch module. Returns NCHW f32 output."""
    B, C, H, W = x.shape
    s = scale_rate
    assert s > 1, "EnlargeChannel only defines the merge path for scale_rate > 1"

    # Mirror PatchMerging's zero-padding of odd spatial dims (module uses s=2).
    pad_h, pad_w = (-H) % s, (-W) % s
    if pad_h or pad_w:
        x = jnp.pad(x, ((0, 0), (0, 0), (0, pad_h), (0, pad_w)))
    Hs, Ws = (H + pad_h) // s, (W + pad_w) // s
    cin = s * s * C
    cout = params["w"].shape[0]
    nb = Hs * Ws

    # Patch-merging gather as ONE fused transpose + bf16 downcast pass:
    # read NCHW f32, write (B, 4C, Hs*Ws) tokens in token_dtype.  Feature
    # order (i, j, c) matches torch.cat([x[:, i::s, j::s, :] ...], -1).
    # TODO(synk): in a full network keep activations feature-major (or do this
    # gather in-kernel from a memory_space=pl.ANY NCHW block) to remove this
    # last extra HBM pass as well.
    xr = x.reshape(B, C, Hs, s, Ws, s)
    tokens = jnp.transpose(xr, (0, 3, 5, 1, 2, 4)).reshape(B, cin, nb)
    tokens = tokens.astype(token_dtype)

    out = _enlarge_channel_tokens(
        tokens,
        params["w"].astype(matmul_dtype),
        params["g1"].astype(jnp.float32).reshape(cin, 1),
        params["b1"].astype(jnp.float32).reshape(cin, 1),
        params["g2"].astype(jnp.float32).reshape(cout, 1),
        params["b2"].astype(jnp.float32).reshape(cout, 1),
        tm=tm)

    # (B, 2C, Hs*Ws) -> (B, 2C, Hs, Ws): pure reshape, no transpose pass.
    return out.reshape(B, cout, Hs, Ws)


def reference_forward(x, params, *, scale_rate):
    """Pure-JAX f32 reference mirroring the PyTorch module exactly."""
    B, C, H, W = x.shape
    s = scale_rate
    xh = jnp.transpose(x, (0, 2, 3, 1))            # flatten(2).transpose(1,2)
    pad_h, pad_w = (-H) % s, (-W) % s
    if pad_h or pad_w:
        xh = jnp.pad(xh, ((0, 0), (0, pad_h), (0, pad_w), (0, 0)))
    parts = [xh[:, i::s, j::s, :] for i in range(s) for j in range(s)]
    t = jnp.concatenate(parts, -1).reshape(B, -1, s * s * C)

    def ln(v, g, b):
        mu = jnp.mean(v, -1, keepdims=True)
        var = jnp.mean((v - mu) ** 2, -1, keepdims=True)
        return (v - mu) * lax.rsqrt(var + EPS) * g + b

    t = ln(t, params["g1"], params["b1"])
    t = t @ params["w"].T          # PyTorch Linear: x @ W^T, W stored (out, in)
    t = ln(t, params["g2"], params["b2"])
    cout = params["w"].shape[0]
    Hs, Ws = (H + pad_h) // s, (W + pad_w) // s
    return jnp.transpose(t, (0, 2, 1)).reshape(B, cout, Hs, Ws)


if __name__ == "__main__":
    B, C, s = 2, 4, 2
    cin, cout = s * s * C, s * C                  # 16, 8

    key = jax.random.PRNGKey(0)
    kx1, kx2, kw, kg1, kb1, kg2, kb2 = jax.random.split(key, 7)
    params = {
        "w":  0.1 * jax.random.normal(kw, (cout, cin), jnp.float32),
        "g1": 1.0 + 0.01 * jax.random.normal(kg1, (cin,), jnp.float32),
        "b1": 0.01 * jax.random.normal(kb1, (cin,), jnp.float32),
        "g2": 1.0 + 0.01 * jax.random.normal(kg2, (cout,), jnp.float32),
        "b2": 0.01 * jax.random.normal(kb2, (cout,), jnp.float32),
    }

    fwd_bf16 = jax.jit(functools.partial(
        enlarge_channel_forward, scale_rate=s,
        token_dtype=jnp.bfloat16, matmul_dtype=jnp.bfloat16))
    fwd_f32 = jax.jit(functools.partial(
        enlarge_channel_forward, scale_rate=s,
        token_dtype=jnp.float32, matmul_dtype=jnp.float32))

    # --- Case 1: 16x16 spatial (64 tokens/image -> single full-width tile) ---
    x1 = jax.random.normal(kx1, (B, C, 16, 16), dtype=jnp.float32)
    ref1 = reference_forward(x1, params, scale_rate=s)

    out1 = jax.block_until_ready(fwd_bf16(x1, params))       # production path
    assert out1.shape == (B, cout, 8, 8)
    assert jnp.allclose(out1, ref1, atol=5e-2, rtol=5e-2)

    out1_f32 = jax.block_until_ready(fwd_f32(x1, params))    # exact-math path
    assert jnp.allclose(out1_f32, ref1, atol=1e-4, rtol=1e-4)

    # --- Case 2: 24x24 spatial (144 tokens/image -> ragged last 128-lane tile,
    #     exercises the no-pad / masked-partial-block path) ---
    x2 = jax.random.normal(kx2, (B, C, 24, 24), dtype=jnp.float32)
    ref2 = reference_forward(x2, params, scale_rate=s)
    out2 = jax.block_until_ready(fwd_f32(x2, params))
    assert out2.shape == (B, cout, 12, 12)
    assert jnp.allclose(out2, ref2, atol=1e-4, rtol=1e-4)

    print("KERNEL_OK")
</pallas_src>

<mosaic_0001>
module attributes {stable_mosaic.version = 11 : i64} {
  func.func @_copy(%arg0: i32, %arg1: memref<8x128xf32, #tpu.memory_space<vmem>>, %arg2: memref<8x128xf32, #tpu.memory_space<vmem>>) attributes {dimension_semantics = [#tpu.dimension_semantics<arbitrary>], iteration_bounds = array<i64: 2>, scalar_prefetch = 0 : i64, scratch_operands = 0 : i64, tpu.core_type = #tpu.core_type<tc>, window_params = [{pipeline_mode = #tpu.pipeline_mode<synchronous>, transform_indices = @transform_0, window_bounds = array<i64: 8, 128>}, {pipeline_mode = #tpu.pipeline_mode<synchronous>, transform_indices = @transform_1, window_bounds = array<i64: 8, 128>}]} {
    %c0 = arith.constant 0 : index
    %c0_0 = arith.constant 0 : index
    %0 = vector.load %arg1[%c0, %c0_0] : memref<8x128xf32, #tpu.memory_space<vmem>>, vector<8x128xf32>
    %c0_1 = arith.constant 0 : index
    %c0_2 = arith.constant 0 : index
    %1 = vector.load %arg2[%c0_1, %c0_2] : memref<8x128xf32, #tpu.memory_space<vmem>>, vector<8x128xf32>
    tpu.vector_store %arg2[%c0_1, %c0_2], %0 {strides = array<i32>} : memref<8x128xf32, #tpu.memory_space<vmem>>, vector<8x128xf32>,
    return
  }
  func.func @transform_0(%arg0: i32) -> (i32, i32) {
    %c0_i32 = arith.constant 0 : i32
    %c0_i32_0 = arith.constant 0 : i32
    %c0_i32_1 = arith.constant 0 : i32
    return %c0_i32, %c0_i32_0 : i32, i32
  }
  func.func @transform_1(%arg0: i32) -> (i32, i32) {
    %c0_i32 = arith.constant 0 : i32
    %c0_i32_0 = arith.constant 0 : i32
    %c0_i32_1 = arith.constant 0 : i32
    return %c0_i32, %c0_i32_0 : i32, i32
  }
}

module attributes {stable_mosaic.version = 11 : i64} {
  func.func @_enlarge_kernel(%arg0: i32, %arg1: i32, %arg2: memref<1x16x64xbf16, #tpu.memory_space<vmem>>, %arg3: memref<8x16xbf16, #tpu.memory_space<vmem>>, %arg4: memref<16x1xf32, #tpu.memory_space<vmem>>, %arg5: memref<16x1xf32, #tpu.memory_space<vmem>>, %arg6: memref<8x1xf32, #tpu.memory_space<vmem>>, %arg7: memref<8x1xf32, #tpu.memory_space<vmem>>, %arg8: memref<1x8x64xf32, #tpu.memory_space<vmem>>) attributes {dimension_semantics = [#tpu.dimension_semantics<parallel>, #tpu.dimension_semantics<parallel>], iteration_bounds = array<i64: 2, 1>, scalar_prefetch = 0 : i64, scratch_operands = 0 : i64, tpu.core_type = #tpu.core_type<tc>, window_params = [{transform_indices = @transform_0, window_bounds = array<i64: 1, 16, 64>}, {pipeline_mode = #tpu.pipeline_mode<synchronous>, transform_indices = @transform_1, window_bounds = array<i64: 8, 16>}, {pipeline_mode = #tpu.pipeline_mode<synchronous>, transform_indices = @transform_2, window_bounds = array<i64: 16, 1>}, {pipeline_mode = #tpu.pipeline_mode<synchronous>, transform_indices = @transform_3, window_bounds = array<i64: 16, 1>}, {pipeline_mode = #tpu.pipeline_mode<synchronous>, transform_indices = @transform_4, window_bounds = array<i64: 8, 1>}, {pipeline_mode = #tpu.pipeline_mode<synchronous>, transform_indices = @transform_5, window_bounds = array<i64: 8, 1>}, {transform_indices = @transform_6, window_bounds = array<i64: 1, 8, 64>}]} {
    %c0 = arith.constant 0 : index
    %c0_0 = arith.constant 0 : index
    %c0_1 = arith.constant 0 : index
    %0 = vector.load %arg2[%c0, %c0_0, %c0_1] : memref<1x16x64xbf16, #tpu.memory_space<vmem>>, vector<1x16x64xbf16>
    %1 = vector.shape_cast %0 : vector<1x16x64xbf16> to vector<16x64xbf16>
    %2 = arith.extf %1 : vector<16x64xbf16> to vector<16x64xf32>
    %cst = arith.constant dense<0.000000e+00> : vector<64xf32>
    %3 = vector.multi_reduction <add>, %2, %cst [0] : vector<16x64xf32> to vector<64xf32>
    %4 = vector.shape_cast %3 : vector<64xf32> to vector<1x64xf32>
    %cst_2 = arith.constant 1.600000e+01 : f32
    %5 = vector.broadcast %cst_2 : f32 to vector<1x64xf32>
    %6 = arith.divf %4, %5 : vector<1x64xf32>
    %7 = vector.broadcast %6 : vector<1x64xf32> to vector<16x64xf32>
    %8 = arith.subf %2, %7 : vector<16x64xf32>
    %9 = arith.mulf %8, %8 : vector<16x64xf32>
    %cst_3 = arith.constant dense<0.000000e+00> : vector<64xf32>
    %10 = vector.multi_reduction <add>, %9, %cst_3 [0] : vector<16x64xf32> to vector<64xf32>
    %11 = vector.shape_cast %10 : vector<64xf32> to vector<1x64xf32>
    %cst_4 = arith.constant 1.600000e+01 : f32
    %12 = vector.broadcast %cst_4 : f32 to vector<1x64xf32>
    %13 = arith.divf %11, %12 : vector<1x64xf32>
    %cst_5 = arith.constant 9.99999974E-6 : f32
    %14 = vector.broadcast %cst_5 : f32 to vector<1x64xf32>
    %15 = arith.addf %13, %14 : vector<1x64xf32>
    %16 = math.rsqrt %15 : vector<1x64xf32>
    %17 = vector.broadcast %16 : vector<1x64xf32> to vector<16x64xf32>
    %18 = arith.mulf %8, %17 : vector<16x64xf32>
    %c0_6 = arith.constant 0 : index
    %c0_7 = arith.constant 0 : index
    %19 = vector.load %arg4[%c0_6, %c0_7] : memref<16x1xf32, #tpu.memory_space<vmem>>, vector<16x1xf32>
    %20 = vector.broadcast %19 : vector<16x1xf32> to vector<16x64xf32>
    %21 = arith.mulf %18, %20 : vector<16x64xf32>
    %c0_8 = arith.constant 0 : index
    %c0_9 = arith.constant 0 : index
    %22 = vector.load %arg5[%c0_8, %c0_9] : memref<16x1xf32, #tpu.memory_space<vmem>>, vector<16x1xf32>
    %23 = vector.broadcast %22 : vector<16x1xf32> to vector<16x64xf32>
    %24 = arith.addf %21, %23 : vector<16x64xf32>
    %c0_10 = arith.constant 0 : index
    %c0_11 = arith.constant 0 : index
    %25 = vector.load %arg3[%c0_10, %c0_11] : memref<8x16xbf16, #tpu.memory_space<vmem>>, vector<8x16xbf16>
    %26 = arith.truncf %24 : vector<16x64xf32> to vector<16x64xbf16>
    %cst_12 = arith.constant dense<0.000000e+00> : vector<8x64xf32>
    %27 = tpu.matmul %25, %26, %cst_12 {dimension_numbers = #tpu.dot_dimension_numbers<[1], [0], [0], [1], [0, 0, 1, 1], [], []>} : vector<8x16xbf16>, vector<16x64xbf16>, vector<8x64xf32> -> vector<8x64xf32>
    %cst_13 = arith.constant dense<0.000000e+00> : vector<64xf32>
    %28 = vector.multi_reduction <add>, %27, %cst_13 [0] : vector<8x64xf32> to vector<64xf32>
    %29 = vector.shape_cast %28 : vector<64xf32> to vector<1x64xf32>
    %cst_14 = arith.constant 8.000000e+00 : f32
    %30 = vector.broadcast %cst_14 : f32 to vector<1x64xf32>
    %31 = arith.divf %29, %30 : vector<1x64xf32>
    %32 = vector.broadcast %31 : vector<1x64xf32> to vector<8x64xf32>
    %33 = arith.subf %27, %32 : vector<8x64xf32>
    %34 = arith.mulf %33, %33 : vector<8x64xf32>
    %cst_15 = arith.constant dense<0.000000e+00> : vector<64xf32>
    %35 = vector.multi_reduction <add>, %34, %cst_15 [0] : vector<8x64xf32> to vector<64xf32>
    %36 = vector.shape_cast %35 : vector<64xf32> to vector<1x64xf32>
    %cst_16 = arith.constant 8.000000e+00 : f32
    %37 = vector.broadcast %cst_16 : f32 to vector<1x64xf32>
    %38 = arith.divf %36, %37 : vector<1x64xf32>
    %cst_17 = arith.constant 9.99999974E-6 : f32
    %39 = vector.broadcast %cst_17 : f32 to vector<1x64xf32>
    %40 = arith.addf %38, %39 : vector<1x64xf32>
    %41 = math.rsqrt %40 : vector<1x64xf32>
    %42 = vector.broadcast %41 : vector<1x64xf32> to vector<8x64xf32>
    %43 = arith.mulf %33, %42 : vector<8x64xf32>
    %c0_18 = arith.constant 0 : index
    %c0_19 = arith.constant 0 : index
    %44 = vector.load %arg6[%c0_18, %c0_19] : memref<8x1xf32, #tpu.memory_space<vmem>>, vector<8x1xf32>
    %45 = vector.broadcast %44 : vector<8x1xf32> to vector<8x64xf32>
    %46 = arith.mulf %43, %45 : vector<8x64xf32>
    %c0_20 = arith.constant 0 : index
    %c0_21 = arith.constant 0 : index
    %47 = vector.load %arg7[%c0_20, %c0_21] : memref<8x1xf32, #tpu.memory_space<vmem>>, vector<8x1xf32>
    %48 = vector.broadcast %47 : vector<8x1xf32> to vector<8x64xf32>
    %49 = arith.addf %46, %48 : vector<8x64xf32>
    %c0_22 = arith.constant 0 : index
    %c0_23 = arith.constant 0 : index
    %c0_24 = arith.constant 0 : index
    %50 = vector.load %arg8[%c0_22, %c0_23, %c0_24] : memref<1x8x64xf32, #tpu.memory_space<vmem>>, vector<1x8x64xf32>
    %51 = vector.shape_cast %50 : vector<1x8x64xf32> to vector<8x64xf32>
    %52 = vector.shape_cast %49 : vector<8x64xf32> to vector<1x8x64xf32>
    tpu.vector_store %arg8[%c0_22, %c0_23, %c0_24], %52 {strides = array<i32>} : memref<1x8x64xf32, #tpu.memory_space<vmem>>, vector<1x8x64xf32>,
    return
  }
  func.func @transform_0(%arg0: i32, %arg1: i32) -> (i32, i32, i32) {
    %c0_i32 = arith.constant 0 : i32
    %c0_i32_0 = arith.constant 0 : i32
    return %arg0, %c0_i32, %arg1 : i32, i32, i32
  }
  func.func @transform_1(%arg0: i32, %arg1: i32) -> (i32, i32) {
    %c0_i32 = arith.constant 0 : i32
    %c0_i32_0 = arith.constant 0 : i32
    %c0_i32_1 = arith.constant 0 : i32
    return %c0_i32, %c0_i32_0 : i32, i32
  }
  func.func @transform_2(%arg0: i32, %arg1: i32) -> (i32, i32) {
    %c0_i32 = arith.constant 0 : i32
    %c0_i32_0 = arith.constant 0 : i32
    %c0_i32_1 = arith.constant 0 : i32
    return %c0_i32, %c0_i32_0 : i32, i32
  }
  func.func @transform_3(%arg0: i32, %arg1: i32) -> (i32, i32) {
    %c0_i32 = arith.constant 0 : i32
    %c0_i32_0 = arith.constant 0 : i32
    %c0_i32_1 = arith.constant 0 : i32
    return %c0_i32, %c0_i32_0 : i32, i32
  }
  func.func @transform_4(%arg0: i32, %arg1: i32) -> (i32, i32) {
    %c0_i32 = arith.constant 0 : i32
    %c0_i32_0 = arith.constant 0 : i32
    %c0_i32_1 = arith.constant 0 : i32
    return %c0_i32, %c0_i32_0 : i32, i32
  }
  func.func @transform_5(%arg0: i32, %arg1: i32) -> (i32, i32) {
    %c0_i32 = arith.constant 0 : i32
    %c0_i32_0 = arith.constant 0 : i32
    %c0_i32_1 = arith.constant 0 : i32
    return %c0_i32, %c0_i32_0 : i32, i32
  }
  func.func @transform_6(%arg0: i32, %arg1: i32) -> (i32, i32, i32) {
    %c0_i32 = arith.constant 0 : i32
    %c0_i32_0 = arith.constant 0 : i32
    return %arg0, %c0_i32, %arg1 : i32, i32, i32
  }
}

</mosaic_0001>

<bundles_post_ra>
// kernel: tpu_custom_call.1
= control target key start
LH: loop header
LB: loop body
LE: loop exit
PB: predicated region body
PF: predicated region fallthrough
CT: control target
= control target key end

     0   :  { %6 = vsyncpa [#allocation3], 0  ;;  %s340_s0 = inlined_call_operand.hbm [shape: f32[8,128], index: 0, kind: input, shape index: {}]   ;;  %s341_s1 = inlined_call_operand.hbm [shape: f32[8,128], index: 1, kind: output, shape index: {}]  }
   0x1   :  { %7 = vsyncpa [#allocation4], 0  ;;  %s261_s6 = smov 0  }
   0x2 LB: > { %s144_s7 = sadd.s32 4294967295, %s247_s6   ;;  %p145_p0 = scmp.ge.s32.totalorder %s247_s6, 1  ;;  %s247_s6 = sphi %s261_s6, %s13_s6  }
   0x3   : > { %p60_p1 = scmp.lt.s32.totalorder %s247_s6, 3  ;;  %p275_p3 = scmp.eq.s32.totalorder %s144_s7, 0 }
   0x4   : > { %s249_s10 = smov [#allocation2]   ;;  %s179_s15 = scalar_lea.hbm %s340_s0, 128 }
   0x5   : > { %p269_p2 = pnand %p145_p0, %p60_p1  ;;  %s73_s11 = sshll.u32 %s249_s10, 4  ;;  %s74_s11 = int_to_ptr.vmem [resolvable:$true] %s73_s11 }
   0x6   : > { %s346_s9 = scalar_select %p275_p3, 1, 0 }
   0x7   : > { %s345_s8 = scalar_select %p269_p2, 1, 0 }
   0x8   : > { %p161_p4 = pneg %p269_p2  ;;  %p180_p6 = scmp.ne.s32.totalorder %s340_s0, %s179_s15 }
   0x9   : > { %p186_p10 = scmp.lt.u32.totalorder %s179_s15, %s340_s0 }
   0xa   : > { %p283_p5 = pnand %p275_p3, %p161_p4 }
   0xc   : > { %p181_p7 = pneg %p283_p5 }
   0xe   : > { %p182_p8 = pnand %p181_p7, %p180_p6 }
  0x10   : > { %p183_p9 = pneg %p182_p8 }
  0x12   : > { %p188_p11 = pnand %p186_p10, %p183_p9 }
  0x14   : > { %191 = shalt.err (!%p188_p11)
}
  0x15   : > { %s192_s20 = scalar_lea.vmem %s74_s11, 128  ;;  %p200_p1 = scmp.lt.s32.totalorder %s74_s11, %s74_s11 }
  0x16   : > { %p193_p12 = scmp.ne.s32.totalorder %s74_s11, %s192_s20  ;;  %p201_p4 = scmp.lt.s32.totalorder %s192_s20, %s192_s20 }
  0x18   : > { %p195_p13 = pnand %p193_p12, %p181_p7  ;;  %p202_p3 = por %p201_p4, %p200_p1 }
  0x1a   : > { %p196_p0 = pneg %p195_p13 }
  0x1c   : > { %p203_p2 = pnand %p202_p3, %p196_p0 }
  0x1e   : > { %206 = shalt.err (!%p203_p2)
}
  0x1f   : > { %164 = dma.hbm_to_vmem [thread:$0]  (!%p283_p5), %s340_s0, 128, %s74_s11, [#allocation3]  }
  0x20   : > { %p348_p6 = scmp.ne.s32.totalorder %s345_s8, 0 }
  0x21   : > { %p349_p8 = scmp.ne.s32.totalorder (!%p348_p6), %s346_s9, 0 }
  0x22   : > { %86 = sbr.rel (%p348_p6) target bundleno = 67 (0x43), region = 24 }
  0x29   : > { %238 = dma.done.wait (%p349_p8), [#allocation3], 128  }
  0x2a   : > { %240 = vsyncadd (%p349_p8), [#allocation3], 4294967168  ;;  %s250_s23 = smov [#allocation5]   ;;  %p311_p2 = scmp.eq.s32.totalorder %s144_s7, 1  ;;  %v96_v0 = vld [vmem:[#allocation2] sm:$0xff] }
  0x2b   : > { %s105_s24 = sshll.u32 %s250_s23, 4  ;;  %97 = vst [vmem:[#allocation5] sm:$0xff] %v96_v0  ;;  %s106_s24 = int_to_ptr.vmem [resolvable:$true] %s105_s24 }
  0x2c   : > { %s207_s26 = scalar_lea.vmem %s106_s24, 128  ;;  %p214_p9 = scmp.lt.s32.totalorder %s106_s24, %s106_s24 }
  0x2d   : > { %p208_p3 = scmp.ne.s32.totalorder %s106_s24, %s207_s26  ;;  %p215_p10 = scmp.lt.s32.totalorder %s207_s26, %s207_s26 }
  0x2f   : > { %p209_p5 = pnand %p208_p3, %p311_p2  ;;  %p216_p11 = por %p215_p10, %p214_p9 }
  0x31   : > { %p210_p7 = pneg %p209_p5 }
  0x33   : > { %p217_p12 = pnand %p216_p11, %p210_p7 }
  0x35   : > { %220 = shalt.err (!%p217_p12)
}
  0x36   : > { %s221_s29 = scalar_lea.hbm %s341_s1, 128 }
  0x37   : > { %p222_p13 = scmp.ne.s32.totalorder %s341_s1, %s221_s29  ;;  %p227_p4 = scmp.lt.u32.totalorder %s221_s29, %s341_s1 }
  0x39   : > { %p223_p0 = pnand %p222_p13, %p311_p2 }
  0x3b   : > { %p224_p1 = pneg %p223_p0 }
  0x3d   : > { %p229_p6 = pnand %p227_p4, %p224_p1 }
  0x3f   : > { %232 = shalt.err (!%p229_p6)
}
  0x40   : > { %158 = dma.vmem_to_hbm [thread:$0]  (%p311_p2), %s106_s24, 128, %s341_s1, [#allocation4]  }
  0x41   : > { %242 = dma.done.wait (%p311_p2), [#allocation4], 128  }
  0x42   : > { %244 = vsyncadd (%p311_p2), [#allocation4], 4294967168 }
  0x43 PF: > { %s13_s6 = sadd.s32 1, %s247_s6  }
  0x44   : > { %p10_p8 = scmp.ge.s32.totalorder %s13_s6, 4  }
  0x46   :  { %12 = sbr.rel (!%p10_p8) target bundleno = 2 (0x2), region = 53 }
  0x4d   :  { %118 = vsyncpa [#allocation3], 1 }
  0x4e   :  { %120 = vsyncpa [#allocation3 + $0x1], 1 }
  0x4f   :  { %121 = vsyncpa [#allocation4], 1 }
  0x50   :  { %123 = vsyncpa [#allocation4 + $0x1], 1 }

// kernel: enlarge_channel_forward.1
= control target key start
LH: loop header
LB: loop body
LE: loop exit
PB: predicated region body
PF: predicated region fallthrough
CT: control target
= control target key end

     0   :  { %s623_s21 = smov 0   ;;  %s625_s22 = smov 0   ;;  %s695_s0 = inlined_call_operand.vmem [shape: bf16[2,16,64], index: 0, kind: input, shape index: {}]   ;;  %s696_s1 = inlined_call_operand.vmem [shape: bf16[8,16], index: 1, kind: input, shape index: {}]   ;;  %s697_s2 = inlined_call_operand.vmem [shape: f32[16,1], index: 2, kind: input, shape index: {}]   ;;  %s698_s3 = inlined_call_operand.vmem [shape: f32[16,1], index: 3, kind: input, shape index: {}]   ;;  %s699_s4 = inlined_call_operand.vmem [shape: f32[8,1], index: 4, kind: input, shape index: {}]   ;;  %s700_s5 = inlined_call_operand.vmem [shape: f32[8,1], index: 5, kind: input, shape index: {}]   ;;  %s701_s6 = inlined_call_operand.vmem [shape: f32[2,8,64], index: 6, kind: output, shape index: {}]  }
   0x1   :  { %s627_s23 = smov 0  }
   0x2 LB: > { %s28_s24 = sadd.s32 1, %s579_s22  ;;  %p508_p0 = scmp.ge.s32.totalorder %s583_s23, 1  ;;  %s583_s23 = sphi %s627_s23, %s16_s23   ;;  %s579_s22 = sphi %s625_s22, %s703_s22   ;;  %s575_s21 = sphi %s623_s21, %s702_s21  }
   0x3   : > { %p30_p1 = scmp.ge.s32.totalorder %s28_s24, 2  ;;  %p231_p2 = scmp.lt.s32.totalorder %s583_s23, 3 }
   0x5   : > { %s705_s24 = smov (%p30_p1, %s28_s24), 0  ;;  %p232_p3 = pnand %p508_p0, %p231_p2 }
   0x6   : > { %v330_v0 = vld [vmem:[%s698_s3] sm:$0xff] (!%p232_p3)  ;;  %v585_v2 = vmov (!%p232_p3), 0   ;;  %v331_v3 = vld [vmem:[%s698_s3 + $0x8] sm:$0xff] (!%p232_p3)  ;;  %v586_v7 = vmov (!%p232_p3), 0.0   ;;  %p266_p4 = scmp.lt.s32.totalorder (!%p232_p3), %s575_s21, 1  ;;  %vm587_vm0 = vmmov (!%p232_p3), 0  }
   0x7   : > { %235 = sbr.rel (%p232_p3) target bundleno = 415 (0x19f), region = 44  ;;  %v316_v1 = vld [vmem:[%s697_s2] sm:$0xff] (!%p232_p3)  ;;  %556 = vset.pattern.permute.xlu1 (!%p232_p3), %v585_v2  ;;  %555 = vset.pattern.permute.xlu0 (!%p232_p3), %v585_v2  ;;  %v317_v4 = vld [vmem:[%s697_s2 + $0x8] sm:$0xff] (!%p232_p3)  ;;  %vm286_vm1 = vcmask (!%p232_p3), 523264   ;;  %vm346_vm2 = vcmask (!%p232_p3), 130048  }
   0x8   : > { %334 = vperm.xlu1 (!%p232_p3), %556, %v330_v0   ;;  %320 = vperm.xlu0 (!%p232_p3), %555, %v316_v1   ;;  %v419_v5 = vld [vmem:[%s700_s5] sm:$0xff] (!%p232_p3) }
   0x9   : > { %v412_v6 = vld [vmem:[%s699_s4] sm:$0xff] (!%p232_p3)  ;;  %522 = vmatprep.subr.bf16.mxu0 (!%p232_p3), %v586_v7  ;;  %524 = vmatprep.mubr.msk.bf16.mxu0 (!%p232_p3), %vm587_vm0, %v586_v7 }
   0xa   : > { %v344_v48 = vld [vmem:[%s696_s1] sm:$0xf] (!%p232_p3) }
   0xc   : > { %339 = vperm.xlu1 (!%p232_p3), %556, %v331_v3   ;;  %325 = vperm.xlu0 (!%p232_p3), %555, %v317_v4  }
   0xe   : > { %s707_s21 = smov (!%p266_p4, %s575_s21), 1 }
   0xf   : > { %s515_s13 = sshll.u32 %s707_s21, 3 }
  0x10   : > { %422 = vperm.xlu1 %556, %v419_v5   ;;  %415 = vperm.xlu0 %555, %v412_v6   ;;  %s273_s16 = scalar_lea.vmem %s695_s0, %s515_s13  ;;  %s280_s25 = scalar_lea.vmem %s701_s6, %s515_s13 }
  0x11   : > { %v517_v8 = vld [vmem:[%s273_s16] sm:$0xff]  }
  0x12   : > { %v518_v9 = vunpack.c.l.bf16 %v517_v8  ;;  %v519_v10 = vunpack.c.h.bf16 %v517_v8 }
  0x14   : > { %v287_v11 = vsel %vm286_vm1, %v518_v9, 0.0  ;;  %v288_v12 = vsel %vm286_vm1, %v519_v10, 0.0 }
  0x15   : > { %v289_v13 = vadd.f32 %v288_v12, %v287_v11 }
  0x17   : > { %v290_v14 = vrot.slane %v289_v13, 4 }
  0x19   : > { %v291_v15 = vadd.f32 %v290_v14, %v289_v13 }
  0x1b   : > { %v292_v16 = vrot.slane %v291_v15, 2 }
  0x1d   : > { %v293_v17 = vadd.f32 %v292_v16, %v291_v15 }
  0x1f   : > { %v294_v18 = vrot.slane %v293_v17, 1 }
  0x21   : > { %v295_v19 = vadd.f32 %v294_v18, %v293_v17 }
  0x23   : > { %v297_v20 = vmul.f32 0.0625, %v295_v19 }
  0x25   : > { %v298_v21 = vsub.f32 %v518_v9, %v297_v20  ;;  %v299_v22 = vsub.f32 %v519_v10, %v297_v20 }
  0x27   : > { %v300_v23 = vmul.f32 %v298_v21, %v298_v21  ;;  %v301_v24 = vmul.f32 %v299_v22, %v299_v22 }
  0x29   : > { %v302_v25 = vsel %vm286_vm1, %v300_v23, 0.0  ;;  %v303_v26 = vsel %vm286_vm1, %v301_v24, 0.0 }
  0x2a   : > { %v304_v27 = vadd.f32 %v303_v26, %v302_v25 }
  0x2c   : > { %v305_v28 = vrot.slane %v304_v27, 4 }
  0x2e   : > { %v306_v29 = vadd.f32 %v305_v28, %v304_v27 }
  0x30   : > { %v307_v30 = vrot.slane %v306_v29, 2 }
  0x32   : > { %v308_v31 = vadd.f32 %v307_v30, %v306_v29 }
  0x34   : > { %v309_v32 = vrot.slane %v308_v31, 1 }
  0x36   : > { %v310_v33 = vadd.f32 %v309_v32, %v308_v31 }
  0x38   : > { %v311_v34 = vmul.f32 0.0625, %v310_v33 }
  0x3a   : > { %v312_v35 = vadd.f32 1e-05, %v311_v34 }
  0x3c   : > { %557 = vrsqrt.f32 %v312_v35 }
  0x46   : > { %v558_v36 = vpop.eup %557 }
  0x47   : > { %v314_v37 = vmul.f32 %v558_v36, %v298_v21  ;;  %v315_v40 = vmul.f32 %v558_v36, %v299_v22 }
  0x87   : > { %v335_v38 = vpop.permute.xlu1 %334  ;;  %v321_v39 = vpop.permute.xlu0 %320 }
  0x88   : > { %v328_v41 = vmul.f32 %v321_v39, %v314_v37 }
  0x8a   : > { %v342_v45 = vadd.f32 %v335_v38, %v328_v41 }
  0x8b   : > { %v326_v42 = vpop.permute.xlu0 %325  ;;  %v340_v44 = vpop.permute.xlu1 %339 }
  0x8c   : > { %v329_v43 = vmul.f32 %v326_v42, %v315_v40 }
  0x8e   : > { %v343_v46 = vadd.f32 %v340_v44, %v329_v43 }
  0x8f   : > { %v416_v10 = vpop.permute.xlu0 %415  ;;  %v423_v12 = vpop.permute.xlu1 %422 }
  0x90   : > { %v345_v47 = vpack.c.bf16 %v343_v46, %v342_v45 }
  0x92   : > { %523 = vmatpush3.bf16.msra.mxu0 %v345_v47 }
  0x95   : > { %525 = vmatmul.mubr.msk.bf16.vlgmr.msra.gmra.mrb[0].mxu0 %vm346_vm2, %v344_v48 }
 0x168   : > { %v384_v49 = vpop.f32.mrb[0].mxu0 }
 0x169   : > { %v390_v50 = vsel %vm286_vm1, %v384_v49, 0.0  ;;  %v526_v51 = vpop.f32.mrb[1].mxu0 }
 0x16a   : > { %v391_v52 = vrot.slane %v390_v50, 4  ;;  %v387_v53 = vpop.f32.mrb[2].mxu0 }
 0x16b   : > { %v527_v54 = vpop.f32.mrb[3].mxu0 }
 0x16c   : > { %v392_v55 = vadd.f32 %v391_v52, %v390_v50 }
 0x16e   : > { %v393_v56 = vrot.slane %v392_v55, 2 }
 0x170   : > { %v394_v57 = vadd.f32 %v393_v56, %v392_v55 }
 0x172   : > { %v395_v58 = vrot.slane %v394_v57, 1 }
 0x174   : > { %v396_v59 = vadd.f32 %v395_v58, %v394_v57 }
 0x176   : > { %v398_v60 = vmul.f32 0.125, %v396_v59 }
 0x178   : > { %v399_v61 = vsub.f32 %v384_v49, %v398_v60 }
 0x17a   : > { %v400_v62 = vmul.f32 %v399_v61, %v399_v61 }
 0x17c   : > { %v401_v63 = vsel %vm286_vm1, %v400_v62, 0.0 }
 0x17d   : > { %v402_v0 = vrot.slane %v401_v63, 4 }
 0x17f   : > { %v403_v1 = vadd.f32 %v402_v0, %v401_v63 }
 0x181   : > { %v404_v2 = vrot.slane %v403_v1, 2 }
 0x183   : > { %v405_v3 = vadd.f32 %v404_v2, %v403_v1 }
 0x185   : > { %v406_v4 = vrot.slane %v405_v3, 1 }
 0x187   : > { %v407_v5 = vadd.f32 %v406_v4, %v405_v3 }
 0x189   : > { %v408_v6 = vmul.f32 0.125, %v407_v5 }
 0x18b   : > { %v409_v7 = vadd.f32 1e-05, %v408_v6 }
 0x18d   : > { %559 = vrsqrt.f32 %v409_v7 }
 0x197   : > { %v560_v8 = vpop.eup %559 }
 0x198   : > { %v411_v9 = vmul.f32 %v560_v8, %v399_v61 }
 0x19a   : > { %v418_v11 = vmul.f32 %v416_v10, %v411_v9 }
 0x19c   : > { %v425_v13 = vadd.f32 %v423_v12, %v418_v11 }
 0x19e   : > { %426 = vst.msk [vmem:[%s280_s25] sm:$0xff] %vm286_vm1, %v425_v13 }
 0x19f PF: > { %s16_s23 = sadd.s32 1, %s583_s23   ;;  %s702_s21 = smov %s579_s22 }
 0x1a0   : > { %p13_p5 = scmp.ge.s32.totalorder %s16_s23, 4   ;;  %s703_s22 = smov %s705_s24 }
 0x1a2   :  { %15 = sbr.rel (!%p13_p5) target bundleno = 2 (0x2), region = 74 }

</bundles_post_ra>
